<compile_context>
chip_gen: v7x
topology: tpu7x:2x2x1
jax: 0.10.0
libtpu: 0.0.40
codegen_flags: <defaults>
</compile_context>

<pallas_src>
import jax
import jax.numpy as jnp
from jax import lax
from jax.experimental import pallas as pl
from jax.experimental.pallas import tpu as pltpu


def _round_up(v, m):
    return ((v + m - 1) // m) * m


def _sublane(dtype):
    # Rows per sublane-tile: 8 for 4-byte, 16 for 2-byte, 32 for 1-byte dtypes.
    return {4: 8, 2: 16, 1: 32}.get(jnp.dtype(dtype).itemsize, 8)


# -----------------------------------------------------------------------------
# Fast path: whole problem in one VMEM block (no grid, no padding).
# -----------------------------------------------------------------------------
def _linear_small_kernel(x_ref, w_ref, b_ref, o_ref):
    """x_ref: [M, K], w_ref: [N, K] (PyTorch layout), b_ref: [1, N], o_ref: [M, N]."""
    acc = lax.dot_general(
        x_ref[...],
        w_ref[...],
        dimension_numbers=(((1,), (1,)), ((), ())),  # contract K on both
        preferred_element_type=jnp.float32,
    )
    o_ref[...] = (acc + b_ref[...].astype(jnp.float32)).astype(o_ref.dtype)


# -----------------------------------------------------------------------------
# Tiled path: (M/tm, N/tn, K/tk) grid with f32 VMEM accumulator.
# -----------------------------------------------------------------------------
def _linear_tiled_kernel(x_ref, w_ref, b_ref, o_ref, acc_ref):
    """x_ref: [tm, tk], w_ref: [tn, tk], b_ref: [1, tn], o_ref: [tm, tn]."""
    k = pl.program_id(2)

    @pl.when(k == 0)
    def _():
        acc_ref[...] = jnp.zeros_like(acc_ref)

    acc_ref[...] += lax.dot_general(
        x_ref[...],
        w_ref[...],
        dimension_numbers=(((1,), (1,)), ((), ())),
        preferred_element_type=jnp.float32,
    )

    @pl.when(k == pl.num_programs(2) - 1)
    def _():
        o_ref[...] = (acc_ref[...] + b_ref[...].astype(jnp.float32)).astype(o_ref.dtype)


# Whole-problem-in-VMEM threshold for the fast path (inputs + output + f32 acc).
_FAST_PATH_VMEM_BYTES = 6 * 1024 * 1024


def linear_norm(x, weight, bias, *, tm=512, tn=512, tk=512):
    """y = x @ weight.T + bias  (PyTorch nn.Linear semantics).

    x:      [..., K]   (K = hp.embedder_lstm_hidden)
    weight: [N, K]     (PyTorch layout, N = hp.embedder_emb_dim)
    bias:   [N]
    """
    orig_shape = x.shape
    K = orig_shape[-1]
    N, Kw = weight.shape
    assert Kw == K and bias.shape == (N,)

    x2d = x.reshape(-1, K)
    M = x2d.shape[0]
    b2d = bias.reshape(1, N)

    itemsize = jnp.dtype(x.dtype).itemsize
    out_dtype = x.dtype

    # ---------------- small-problem fast path ---------------------------------
    total_bytes = (M * K + N * K + N) * itemsize + M * N * (itemsize + 4)
    if total_bytes <= _FAST_PATH_VMEM_BYTES and max(M, N, K) <= 2048:
        out = pl.pallas_call(
            _linear_small_kernel,
            out_shape=jax.ShapeDtypeStruct((M, N), out_dtype),
        )(x2d, weight, b2d)
        return out.reshape(*orig_shape[:-1], N)

    # ---------------- tiled path ----------------------------------------------
    sub = _sublane(x.dtype)

    # K is the reduction dim: it must have no partial blocks (garbage in a partial
    # K block would contaminate valid outputs).  Use tk = K when small enough,
    # otherwise zero-pad K only (M/N stay unpadded in HBM).
    if K <= 1024:
        tk, Kp = K, K
    else:
        tk = min(tk, 1024)
        Kp = _round_up(K, tk)

    x_p = x2d if Kp == K else jnp.pad(x2d, ((0, 0), (0, Kp - K)))
    w_p = weight if Kp == K else jnp.pad(weight, ((0, 0), (0, Kp - K)))

    # M/N: no HBM padding; partial edge blocks are masked by Pallas on write.
    tm = min(tm, _round_up(M, sub))
    tn = min(tn, _round_up(N, 128))

    # v7x megacore: make sure there are >= 2 parallel (i, j) blocks when possible
    # so both TensorCores get work.
    if pl.cdiv(M, tm) * pl.cdiv(N, tn) < 2 and M >= 2 * sub:
        tm = _round_up(pl.cdiv(M, 2), sub)

    grid = (pl.cdiv(M, tm), pl.cdiv(N, tn), Kp // tk)

    # Double-buffered input/output tiles + f32 accumulator footprint; clamp the
    # scoped-VMEM request to 48 MiB so it also fits v7x's 64 MiB physical VMEM.
    tile_bytes = (
        2 * (tm * tk + tn * tk + tn) * itemsize  # double-buffered x, W, bias
        + 2 * tm * tn * itemsize                 # double-buffered output
        + tm * tn * 4                            # f32 accumulator scratch
    )
    vmem_limit = int(min(48 * 1024 * 1024, max(32 * 1024 * 1024, 2 * tile_bytes)))

    cost = pl.CostEstimate(
        flops=2 * M * N * Kp,
        transcendentals=0,
        bytes_accessed=(grid[1] * M * Kp + grid[0] * N * Kp + N) * itemsize
        + M * N * jnp.dtype(out_dtype).itemsize,
    )

    # TODO(synk): if profiling shows exposed DMA (skinny-M / short-K shapes), add
    # pipeline_mode=pl.Buffered(3) to the x / weight BlockSpecs (budget the extra
    # tile of VMEM per input against the v7x 64 MiB cap).
    out = pl.pallas_call(
        _linear_tiled_kernel,
        out_shape=jax.ShapeDtypeStruct((M, N), out_dtype),
        grid_spec=pltpu.PrefetchScalarGridSpec(
            num_scalar_prefetch=0,
            grid=grid,
            in_specs=[
                pl.BlockSpec((tm, tk), lambda i, j, k: (i, k)),  # x tile
                pl.BlockSpec((tn, tk), lambda i, j, k: (j, k)),  # W tile, [N, K] layout
                pl.BlockSpec((1, tn), lambda i, j, k: (0, j)),   # bias tile (N only)
            ],
            out_specs=pl.BlockSpec((tm, tn), lambda i, j, k: (i, j)),
            scratch_shapes=[pltpu.VMEM((tm, tn), jnp.float32)],
        ),
        compiler_params=pltpu.CompilerParams(
            dimension_semantics=("parallel", "parallel", "arbitrary"),
            vmem_limit_bytes=vmem_limit,
        ),
        cost_estimate=cost,
    )(x_p, w_p, b2d)

    return out.reshape(*orig_shape[:-1], N)


if __name__ == "__main__":
    # Module-consistent small shapes: hp.embedder_lstm_hidden=32, hp.embedder_emb_dim=64.
    hidden = 32
    emb_dim = 64
    batch, seq = 2, 8

    key = jax.random.PRNGKey(0)
    kx, kw, kb = jax.random.split(key, 3)

    # PyTorch nn.Linear-style uniform init, bound 1/sqrt(in_features).
    bound = 1.0 / (hidden ** 0.5)
    weight = jax.random.uniform(kw, (emb_dim, hidden), jnp.float32, -bound, bound)
    bias = jax.random.uniform(kb, (emb_dim,), jnp.float32, -bound, bound)
    x = jax.random.normal(kx, (batch, seq, hidden), jnp.float32)

    y = jax.block_until_ready(linear_norm(x, weight, bias))
    ref = jnp.einsum("bsk,nk->bsn", x, weight, precision="highest") + bias
    assert y.shape == (batch, seq, emb_dim)
    assert jnp.allclose(y, ref, atol=1e-4, rtol=1e-4)

    # Secondary check: exercise the tiled path (unpadded M/N edges, tk = K).
    k2 = jax.random.PRNGKey(1)
    ka, kwb, kbb = jax.random.split(k2, 3)
    M2, K2, N2 = 512, 1024, 640
    x2 = jax.random.normal(ka, (M2, K2), jnp.float32)
    w2 = jax.random.uniform(kwb, (N2, K2), jnp.float32, -0.03, 0.03)
    b2 = jax.random.uniform(kbb, (N2,), jnp.float32, -0.03, 0.03)
    y2 = jax.block_until_ready(linear_norm(x2, w2, b2))
    ref2 = jnp.einsum("mk,nk->mn", x2, w2, precision="highest") + b2
    assert y2.shape == (M2, N2)
    assert jnp.allclose(y2, ref2, atol=1e-3, rtol=1e-3)

    print("KERNEL_OK")
</pallas_src>

<mosaic_0001>
module attributes {stable_mosaic.version = 11 : i64} {
  func.func @_linear_small_kernel(%arg0: memref<16x32xf32, #tpu.memory_space<vmem>>, %arg1: memref<64x32xf32, #tpu.memory_space<vmem>>, %arg2: memref<1x64xf32, #tpu.memory_space<vmem>>, %arg3: memref<16x64xf32, #tpu.memory_space<vmem>>) attributes {dimension_semantics = [], scalar_prefetch = 0 : i64, scratch_operands = 0 : i64, tpu.core_type = #tpu.core_type<tc>} {
    %c0 = arith.constant 0 : index
    %c0_0 = arith.constant 0 : index
    %0 = vector.load %arg0[%c0, %c0_0] : memref<16x32xf32, #tpu.memory_space<vmem>>, vector<16x32xf32>
    %c0_1 = arith.constant 0 : index
    %c0_2 = arith.constant 0 : index
    %1 = vector.load %arg1[%c0_1, %c0_2] : memref<64x32xf32, #tpu.memory_space<vmem>>, vector<64x32xf32>
    %cst = arith.constant dense<0.000000e+00> : vector<16x64xf32>
    %2 = tpu.matmul %0, %1, %cst {dimension_numbers = #tpu.dot_dimension_numbers<[1], [1], [0], [0], [0, 0, 1, 0], [], []>} : vector<16x32xf32>, vector<64x32xf32>, vector<16x64xf32> -> vector<16x64xf32>
    %c0_3 = arith.constant 0 : index
    %c0_4 = arith.constant 0 : index
    %3 = vector.load %arg2[%c0_3, %c0_4] : memref<1x64xf32, #tpu.memory_space<vmem>>, vector<1x64xf32>
    %4 = vector.broadcast %3 : vector<1x64xf32> to vector<16x64xf32>
    %5 = arith.addf %2, %4 : vector<16x64xf32>
    %c0_5 = arith.constant 0 : index
    %c0_6 = arith.constant 0 : index
    %6 = vector.load %arg3[%c0_5, %c0_6] : memref<16x64xf32, #tpu.memory_space<vmem>>, vector<16x64xf32>
    tpu.vector_store %arg3[%c0_5, %c0_6], %5 {strides = array<i32>} : memref<16x64xf32, #tpu.memory_space<vmem>>, vector<16x64xf32>,
    return
  }
}

</mosaic_0001>

<bundles_post_ra>
// kernel: tpu_custom_call.1
= control target key start
LH: loop header
LB: loop body
LE: loop exit
PB: predicated region body
PF: predicated region fallthrough
CT: control target
= control target key end

     0   :  { %vm32_vm0 = vcmask 261120   ;;  %s340_s0 = inlined_call_operand.vmem [shape: f32[16,32], index: 0, kind: input, shape index: {}]   ;;  %s341_s1 = inlined_call_operand.vmem [shape: f32[64,32], index: 1, kind: input, shape index: {}]   ;;  %s342_s2 = inlined_call_operand.vmem [shape: f32[1,64], index: 2, kind: input, shape index: {}]   ;;  %s343_s3 = inlined_call_operand.hbm [shape: f32[16,64], index: 3, kind: output, shape index: {}]  }
   0x1   :  { %v17_v0 = vld [vmem:[%s341_s1] sm:$0xff]  ;;  %v18_v1 = vld [vmem:[%s341_s1 + $0x8] sm:$0xff]  ;;  %v19_v2 = vld [vmem:[%s341_s1 + $0x10] sm:$0xff] }
   0x2   :  { %v197_v3 = vpack.c.bf16 %v18_v1, %v17_v0  ;;  %vm282_vm1 = vmpackc.low %vm32_vm0, %vm32_vm0  ;;  %v20_v5 = vld [vmem:[%s341_s1 + $0x18] sm:$0xff]  ;;  %v15_v7 = vld [vmem:[%s340_s0] sm:$0xff] }
   0x3   :  { %v203_v6 = vpack.c.bf16 %v20_v5, %v19_v2 }
   0x4   :  { %199 = vmatprep.subr.msk.bf16.mxu0 %vm282_vm1, %v197_v3 }
   0x5   :  { %8 = vsyncpa [#allocation3], 0  ;;  %202 = vmatpush3.bf16.xpose.msk.msra.mxu0 %vm282_vm1, %v197_v3  ;;  %194 = vmatprep.mubr.msk.f32.mxu0 %vm32_vm0, %v15_v7  ;;  %v21_v8 = vld [vmem:[%s341_s1 + $0x20] sm:$0xff]  ;;  %v22_v9 = vld [vmem:[%s341_s1 + $0x28] sm:$0xff]  ;;  %vm138_vm2 = vcmask 523264  }
   0x6   :  { %205 = vmatprep.subr.msk.bf16.mxu0 %vm282_vm1, %v203_v6  ;;  %v209_v10 = vpack.c.bf16 %v22_v9, %v21_v8  ;;  %v23_v11 = vld [vmem:[%s341_s1 + $0x30] sm:$0xff]  ;;  %v24_v12 = vld [vmem:[%s341_s1 + $0x38] sm:$0xff]  ;;  %v16_v14 = vld [vmem:[%s340_s0 + $0x8] sm:$0xff]  ;;  %s248_s1 = smov [#allocation2]  }
   0x7   :  { %v215_v13 = vpack.c.bf16 %v24_v12, %v23_v11  ;;  %v157_v15 = vld [vmem:[%s342_s2] ss:$0 sm:$0xff]  ;;  %s146_s7 = sshll.u32 %s248_s1, 4  ;;  %s147_s7 = int_to_ptr.vmem [resolvable:$true] %s146_s7 }
   0x8   :  { %s224_s8 = scalar_lea.vmem %s147_s7, 256  ;;  %p229_p1 = scmp.lt.s32.totalorder %s147_s7, %s147_s7 }
   0x9   :  { %p225_p0 = scmp.ne.s32.totalorder %s147_s7, %s224_s8  ;;  %p230_p2 = scmp.lt.s32.totalorder %s224_s8, %s224_s8 }
   0xb   :  { %p231_p3 = por %p230_p2, %p229_p1 }
   0xd   :  { %208 = vmatpush3.bf16.xpose.msk.msra.mxu0 %vm282_vm1, %v203_v6  ;;  %p232_p4 = pnand %p231_p3, %p225_p0 }
   0xe   :  { %211 = vmatprep.subr.msk.bf16.mxu0 %vm282_vm1, %v209_v10 }
  0x15   :  { %214 = vmatpush3.bf16.xpose.msk.msra.mxu0 %vm282_vm1, %v209_v10 }
  0x16   :  { %217 = vmatprep.subr.msk.bf16.mxu0 %vm282_vm1, %v215_v13 }
  0x1d   :  { %220 = vmatpush3.bf16.xpose.msk.msra.mxu0 %vm282_vm1, %v215_v13 }
  0x24   :  { %195 = vmatmul.mubr.msk.f32.vlgmr.msra.gmra.mrb[0].mxu0 %vm32_vm0, %v16_v14 }
  0xf7   :  { %v196_v16 = vpop.f32.mrb[0].mxu0 }
  0xf8   :  { %v135_v17 = vadd.f32 %v196_v16, %v157_v15  ;;  %v129_v18 = vpop.f32.mrb[1].mxu0 }
  0xf9   :  { %v130_v19 = vadd.f32 %v157_v15, %v129_v18 }
  0xfa   :  { %140 = vst.msk [vmem:[#allocation2 + $0x8] sm:$0xff] %vm138_vm2, %v135_v17 }
  0xfb   :  { %139 = vst.msk [vmem:[#allocation2] sm:$0xff] %vm138_vm2, %v130_v19 }
  0xfc   :  { %235 = shalt.err (!%p232_p4)
}
  0xfd   :  { %s236_s2 = scalar_lea.hbm %s343_s3, 256 }
  0xfe   :  { %p237_p5 = scmp.ne.s32.totalorder %s343_s3, %s236_s2  ;;  %p240_p6 = scmp.lt.u32.totalorder %s236_s2, %s343_s3 }
 0x100   :  { %p242_p7 = pnand %p240_p6, %p237_p5 }
 0x102   :  { %245 = shalt.err (!%p242_p7)
}
 0x103   :  { %s249_s14 = smov 128   ;;  %s250_s15 = smov 8  }
 0x104   :  { %152 = dma.vmem_to_hbm [thread:$0]  %s147_s7, 256, %s343_s3, [#allocation3], %s249_s14, %s249_s14, %s250_s15  }
 0x105   :  { %246 = dma.done.wait [#allocation3], 256  }
 0x106   :  { %247 = vsyncadd [#allocation3], 4294967040 }
 0x107   :  { %156 = vsyncpa [#allocation3], 1 }

</bundles_post_ra>
